<compile_context>
chip_gen: v6e
topology: v6e:2x2x1
jax: 0.10.0
libtpu: 0.0.40
codegen_flags: <defaults>
</compile_context>

<pallas_src>
import functools

import jax
import jax.numpy as jnp
from jax.experimental import pallas as pl
from jax.experimental.pallas import tpu as pltpu


def _attn_gated_kernel(x_ref, wab_ref, bab_ref, wc_ref, bc_ref, out_ref, *,
                       vpu_proj):
    """One N-tile of the gated-attention forward.

    x_ref   : [tile_n, L]  (compute dtype: f32 or bf16)
    wab_ref : [L, 2D]      fused Wa|Wb (resident across grid steps)
    bab_ref : [1, 2D]      fused ba|bb (f32)
    wc_ref  : [1, D] (vpu_proj) or [D, T]
    bc_ref  : [1, T]       (f32)
    out_ref : [tile_n, T]
    """
    d2 = wab_ref.shape[-1]
    d = d2 // 2

    # Single fused MXU pass for both gating branches; f32 accumulation.
    h = jnp.dot(x_ref[...], wab_ref[...],
                preferred_element_type=jnp.float32) + bab_ref[...]
    a = jnp.tanh(h[:, :d])
    b = jax.nn.sigmoid(h[:, d:])
    gated = a * b  # 'dot' attention mechanism

    if vpu_proj:
        # n_tasks == 1: width-1 projection as VPU multiply + lane reduction;
        # a 1-wide matmul would waste the systolic array and an MRF/MRB drain.
        out = jnp.sum(gated * wc_ref[...], axis=-1, keepdims=True) + bc_ref[...]
    else:
        out = jnp.dot(gated.astype(wc_ref.dtype), wc_ref[...],
                      preferred_element_type=jnp.float32) + bc_ref[...]

    out_ref[...] = out.astype(out_ref.dtype)


def _choose_tile_n(n, l, d2, t, x_itemsize, budget_bytes=20 * 1024 * 1024):
    """Largest row tile (multiple of 8 sublanes) whose working set fits the budget."""
    weight_bytes = (l * d2 + (d2 // 2) * max(t, 1) + d2 + max(t, 1)) * 4
    for tile in (1024, 512, 256, 128, 64, 32, 16, 8):
        if tile > n:
            continue
        io_bytes = 2 * tile * l * x_itemsize + 2 * tile * max(t, 1) * 4  # dbl-buffered
        scratch = 3 * tile * d2 * 4  # h / a / b / gated f32 temporaries (rough)
        if weight_bytes + io_bytes + scratch <= budget_bytes:
            return tile
    # n < 8: a block equal to the full array dim is allowed.
    return n if n < 8 else 8


def attn_net_gated(x, wa, ba, wb, bb, wc, bc, *, compute_dtype=None, tile_n=None):
    """Pallas forward of Attn_Net_Gated (attention_mechanism='dot').

    x:  [N, L]
    wa: [L, D], ba: [1, D]   (attention_a Linear, stored as [in, out])
    wb: [L, D], bb: [1, D]   (attention_b Linear)
    wc: [D, T], bc: [1, T]   (attention_c Linear)
    compute_dtype: optionally cast x / Wa / Wb (/ Wc for T>1) once in the wrapper
                   (e.g. jnp.bfloat16) for MXU throughput; accumulation stays f32.
    Returns (A: [N, T], x) matching the PyTorch module.
    """
    x_orig = x
    n, l = x.shape
    d = wa.shape[1]
    t = wc.shape[1]
    out_dtype = x.dtype

    # Cast ONCE here (never inside the kernel body — weights are VMEM-resident).
    if compute_dtype is not None:
        x = x.astype(compute_dtype)
        wa = wa.astype(compute_dtype)
        wb = wb.astype(compute_dtype)

    # Fuse the two gating projections into one MXU pass: [L, 2D].
    wab = jnp.concatenate([wa, wb], axis=1)
    bab = jnp.concatenate([ba, bb], axis=1).astype(jnp.float32)
    bc32 = bc.astype(jnp.float32)

    vpu_proj = (t == 1)
    if vpu_proj:
        # Row layout for the VPU multiply+reduce path; keep f32 (it never hits the MXU).
        wc_arg = wc.reshape(1, d).astype(jnp.float32)
    else:
        wc_arg = wc.astype(compute_dtype) if compute_dtype is not None else wc

    x_itemsize = jnp.dtype(x.dtype).itemsize
    tile = tile_n if tile_n is not None else _choose_tile_n(n, l, 2 * d, t, x_itemsize)
    grid = (pl.cdiv(n, tile),)  # partial last tile is fine: rows are independent

    const2d = lambda i: (0, 0)  # resident weights/biases: same block every grid step
    in_specs = [
        pl.BlockSpec((tile, l), lambda i: (i, 0)),
        pl.BlockSpec(wab.shape, const2d),
        pl.BlockSpec(bab.shape, const2d),
        pl.BlockSpec(wc_arg.shape, const2d),
        pl.BlockSpec(bc32.shape, const2d),
    ]
    out_specs = pl.BlockSpec((tile, t), lambda i: (i, 0))

    flops = 2 * n * l * (2 * d) + 3 * n * d + 2 * n * d * t
    transcendentals = 2 * n * d
    bytes_accessed = (
        n * l * x_itemsize
        + n * t * jnp.dtype(out_dtype).itemsize
        + wab.size * jnp.dtype(wab.dtype).itemsize
        + wc_arg.size * jnp.dtype(wc_arg.dtype).itemsize
        + (bab.size + bc32.size) * 4
    )

    A = pl.pallas_call(
        functools.partial(_attn_gated_kernel, vpu_proj=vpu_proj),
        out_shape=jax.ShapeDtypeStruct((n, t), out_dtype),
        grid=grid,
        in_specs=in_specs,
        out_specs=out_specs,
        compiler_params=pltpu.CompilerParams(
            dimension_semantics=("parallel",),     # shard row tiles across TCs on v7x
            vmem_limit_bytes=48 * 1024 * 1024,     # < 64 MiB v7x physical; lifts defaults
        ),
        cost_estimate=pl.CostEstimate(
            flops=int(flops),
            transcendentals=int(transcendentals),
            bytes_accessed=int(bytes_accessed),
        ),
    )(x, wab, bab, wc_arg, bc32)

    # Reference module returns the input unchanged as the second output.
    return A, x_orig


def init_params(key, L, D, n_tasks, dtype=jnp.float32):
    """Deterministic init mimicking torch.nn.Linear default (U[-1/sqrt(fan_in), ...])."""
    ks = jax.random.split(key, 6)
    la = 1.0 / (L ** 0.5)
    lc = 1.0 / (D ** 0.5)
    wa = jax.random.uniform(ks[0], (L, D), dtype, -la, la)
    ba = jax.random.uniform(ks[1], (1, D), dtype, -la, la)
    wb = jax.random.uniform(ks[2], (L, D), dtype, -la, la)
    bb = jax.random.uniform(ks[3], (1, D), dtype, -la, la)
    wc = jax.random.uniform(ks[4], (D, n_tasks), dtype, -lc, lc)
    bc = jax.random.uniform(ks[5], (1, n_tasks), dtype, -lc, lc)
    return wa, ba, wb, bb, wc, bc


if __name__ == "__main__":
    # Small lane-friendly shapes consistent with the module (real model: L=1024, D=256, T=1).
    N, L, D, n_tasks = 16, 128, 64, 1

    key = jax.random.PRNGKey(0)
    kx, kp = jax.random.split(key)
    x = jax.random.normal(kx, (N, L), jnp.float32)
    params = init_params(kp, L, D, n_tasks)
    wa, ba, wb, bb, wc, bc = params

    # Pure-JAX fp32 reference.
    A_ref = (jnp.tanh(x @ wa + ba) * jax.nn.sigmoid(x @ wb + bb)) @ wc + bc

    # 1) fp32 operands (default), n_tasks == 1 -> VPU projection path.
    A32, x_out = attn_net_gated(x, *params)
    jax.block_until_ready((A32, x_out))
    assert A32.shape == (N, n_tasks)
    assert jnp.allclose(A32, A_ref, atol=1e-3, rtol=1e-3)
    assert jnp.array_equal(x_out, x)

    # 2) bf16 operands fed to the MXU, f32 accumulation (looser tolerance).
    A16, _ = attn_net_gated(x, *params, compute_dtype=jnp.bfloat16)
    jax.block_until_ready(A16)
    assert jnp.allclose(A16, A_ref, atol=1e-1, rtol=1e-1)

    # 3) multi-task head (n_tasks > 1) exercises the MXU projection branch.
    params4 = init_params(jax.random.PRNGKey(1), L, D, 4)
    wa4, ba4, wb4, bb4, wc4, bc4 = params4
    A4_ref = (jnp.tanh(x @ wa4 + ba4) * jax.nn.sigmoid(x @ wb4 + bb4)) @ wc4 + bc4
    A4, _ = attn_net_gated(x, *params4)
    jax.block_until_ready(A4)
    assert A4.shape == (N, 4)
    assert jnp.allclose(A4, A4_ref, atol=1e-3, rtol=1e-3)

    print("KERNEL_OK")
</pallas_src>

<mosaic_0001>
module attributes {stable_mosaic.version = 11 : i64} {
  func.func @_attn_gated_kernel(%arg0: i32, %arg1: memref<16x128xf32, #tpu.memory_space<vmem>>, %arg2: memref<128x128xf32, #tpu.memory_space<vmem>>, %arg3: memref<1x128xf32, #tpu.memory_space<vmem>>, %arg4: memref<1x64xf32, #tpu.memory_space<vmem>>, %arg5: memref<1x1xf32, #tpu.memory_space<vmem>>, %arg6: memref<16x1xf32, #tpu.memory_space<vmem>>) attributes {dimension_semantics = [#tpu.dimension_semantics<parallel>], iteration_bounds = array<i64: 1>, scalar_prefetch = 0 : i64, scratch_operands = 0 : i64, tpu.core_type = #tpu.core_type<tc>, window_params = [{transform_indices = @transform_0, window_bounds = array<i64: 16, 128>}, {pipeline_mode = #tpu.pipeline_mode<synchronous>, transform_indices = @transform_1, window_bounds = array<i64: 128, 128>}, {pipeline_mode = #tpu.pipeline_mode<synchronous>, transform_indices = @transform_2, window_bounds = array<i64: 1, 128>}, {pipeline_mode = #tpu.pipeline_mode<synchronous>, transform_indices = @transform_3, window_bounds = array<i64: 1, 64>}, {pipeline_mode = #tpu.pipeline_mode<synchronous>, transform_indices = @transform_4, window_bounds = array<i64: 1, 1>}, {transform_indices = @transform_5, window_bounds = array<i64: 16, 1>}]} {
    %c0 = arith.constant 0 : index
    %c0_0 = arith.constant 0 : index
    %0 = vector.load %arg1[%c0, %c0_0] : memref<16x128xf32, #tpu.memory_space<vmem>>, vector<16x128xf32>
    %c0_1 = arith.constant 0 : index
    %c0_2 = arith.constant 0 : index
    %1 = vector.load %arg2[%c0_1, %c0_2] : memref<128x128xf32, #tpu.memory_space<vmem>>, vector<128x128xf32>
    %cst = arith.constant dense<0.000000e+00> : vector<16x128xf32>
    %2 = tpu.matmul %0, %1, %cst {dimension_numbers = #tpu.dot_dimension_numbers<[1], [0], [0], [1], [0, 0, 1, 1], [], []>} : vector<16x128xf32>, vector<128x128xf32>, vector<16x128xf32> -> vector<16x128xf32>
    %c0_3 = arith.constant 0 : index
    %c0_4 = arith.constant 0 : index
    %3 = vector.load %arg3[%c0_3, %c0_4] : memref<1x128xf32, #tpu.memory_space<vmem>>, vector<1x128xf32>
    %4 = vector.broadcast %3 : vector<1x128xf32> to vector<16x128xf32>
    %5 = arith.addf %2, %4 : vector<16x128xf32>
    %6 = vector.extract_strided_slice %5 {offsets = [0, 0], sizes = [16, 64], strides = [1, 1]} : vector<16x128xf32> to vector<16x64xf32>
    %7 = math.tanh %6 : vector<16x64xf32>
    %8 = vector.extract_strided_slice %5 {offsets = [0, 64], sizes = [16, 64], strides = [1, 1]} : vector<16x128xf32> to vector<16x64xf32>
    %9 = arith.negf %8 : vector<16x64xf32>
    %10 = math.exp %9 : vector<16x64xf32>
    %cst_5 = arith.constant 1.000000e+00 : f32
    %11 = vector.broadcast %cst_5 : f32 to vector<16x64xf32>
    %12 = arith.addf %11, %10 : vector<16x64xf32>
    %13 = arith.divf %11, %12 : vector<16x64xf32>
    %14 = arith.mulf %7, %13 : vector<16x64xf32>
    %c0_6 = arith.constant 0 : index
    %c0_7 = arith.constant 0 : index
    %15 = vector.load %arg4[%c0_6, %c0_7] : memref<1x64xf32, #tpu.memory_space<vmem>>, vector<1x64xf32>
    %16 = vector.broadcast %15 : vector<1x64xf32> to vector<16x64xf32>
    %17 = arith.mulf %14, %16 : vector<16x64xf32>
    %cst_8 = arith.constant dense<0.000000e+00> : vector<16xf32>
    %18 = vector.multi_reduction <add>, %17, %cst_8 [1] : vector<16x64xf32> to vector<16xf32>
    %19 = vector.shape_cast %18 : vector<16xf32> to vector<16x1xf32>
    %c0_9 = arith.constant 0 : index
    %c0_10 = arith.constant 0 : index
    %20 = vector.load %arg5[%c0_9, %c0_10] : memref<1x1xf32, #tpu.memory_space<vmem>>, vector<1x1xf32>
    %21 = vector.broadcast %20 : vector<1x1xf32> to vector<16x1xf32>
    %22 = arith.addf %19, %21 : vector<16x1xf32>
    %c0_11 = arith.constant 0 : index
    %c0_12 = arith.constant 0 : index
    %23 = vector.load %arg6[%c0_11, %c0_12] : memref<16x1xf32, #tpu.memory_space<vmem>>, vector<16x1xf32>
    tpu.vector_store %arg6[%c0_11, %c0_12], %22 {strides = array<i32>} : memref<16x1xf32, #tpu.memory_space<vmem>>, vector<16x1xf32>,
    return
  }
  func.func @transform_0(%arg0: i32) -> (i32, i32) {
    %c0_i32 = arith.constant 0 : i32
    %c0_i32_0 = arith.constant 0 : i32
    return %arg0, %c0_i32 : i32, i32
  }
  func.func @transform_1(%arg0: i32) -> (i32, i32) {
    %c0_i32 = arith.constant 0 : i32
    %c0_i32_0 = arith.constant 0 : i32
    %c0_i32_1 = arith.constant 0 : i32
    return %c0_i32, %c0_i32_0 : i32, i32
  }
  func.func @transform_2(%arg0: i32) -> (i32, i32) {
    %c0_i32 = arith.constant 0 : i32
    %c0_i32_0 = arith.constant 0 : i32
    %c0_i32_1 = arith.constant 0 : i32
    return %c0_i32, %c0_i32_0 : i32, i32
  }
  func.func @transform_3(%arg0: i32) -> (i32, i32) {
    %c0_i32 = arith.constant 0 : i32
    %c0_i32_0 = arith.constant 0 : i32
    %c0_i32_1 = arith.constant 0 : i32
    return %c0_i32, %c0_i32_0 : i32, i32
  }
  func.func @transform_4(%arg0: i32) -> (i32, i32) {
    %c0_i32 = arith.constant 0 : i32
    %c0_i32_0 = arith.constant 0 : i32
    %c0_i32_1 = arith.constant 0 : i32
    return %c0_i32, %c0_i32_0 : i32, i32
  }
  func.func @transform_5(%arg0: i32) -> (i32, i32) {
    %c0_i32 = arith.constant 0 : i32
    %c0_i32_0 = arith.constant 0 : i32
    return %arg0, %c0_i32 : i32, i32
  }
}

</mosaic_0001>

<bundles_post_ra>
// kernel: tpu_custom_call.1
= control target key start
LH: loop header
LB: loop body
LE: loop exit
PB: predicated region body
PF: predicated region fallthrough
CT: control target
= control target key end

     0   :  { %s383_s0 = inlined_call_operand.hbm [shape: f32[16,128], index: 0, kind: input, shape index: {}]   ;;  %s384_s1 = inlined_call_operand.hbm [shape: f32[128,128], index: 1, kind: input, shape index: {}]   ;;  %s385_s2 = inlined_call_operand.vmem [shape: f32[1,128], index: 2, kind: input, shape index: {}]   ;;  %s386_s3 = inlined_call_operand.vmem [shape: f32[1,64], index: 3, kind: input, shape index: {}]   ;;  %s387_s4 = inlined_call_operand.<no memory space> [shape: f32[1,1], index: 4, kind: input, shape index: {}]   ;;  %s388_s5 = inlined_call_operand.vmem [shape: f32[16,1], index: 5, kind: output, shape index: {}]  }
   0x1   :  { %v10_v0 = vstv %s387_s4 }
   0x2   :  { %11 = vst [vmem:[#allocation2] sm:$0x1] %v10_v0 }
   0x3   :  { %12 = vsyncpa [#allocation4], 0 }
   0x4   :  { %13 = vsyncpa [#allocation6], 0  ;;  %s327_s20 = smov [#allocation3]  }
   0x5   :  { %s19_s21 = sshll.u32 %s327_s20, 4  ;;  %s20_s21 = int_to_ptr.vmem [resolvable:$true] %s19_s21 }
   0x6   :  { %s291_s22 = scalar_lea.vmem %s20_s21, 256  ;;  %p296_p1 = scmp.lt.s32.totalorder %s20_s21, %s20_s21 }
   0x7   :  { %p292_p0 = scmp.ne.s32.totalorder %s20_s21, %s291_s22  ;;  %p297_p2 = scmp.lt.s32.totalorder %s291_s22, %s291_s22 }
   0x9   :  { %p298_p3 = por %p297_p2, %p296_p1 }
   0xb   :  { %p299_p4 = pnand %p298_p3, %p292_p0 }
   0xd   :  { %302 = shalt.err (!%p299_p4)
}
   0xe   :  { %s328_s23 = smov 128   ;;  %s329_s24 = smov 8  }
   0xf   :  { %25 = dma.hbm_to_vmem [thread:$0]  %s383_s0, 256, %s20_s21, [#allocation4], %s328_s23, %s328_s23, %s329_s24  }
  0x10   :  { %s330_s4 = smov [#allocation5]  }
  0x11   :  { %s31_s27 = sshll.u32 %s330_s4, 4  ;;  %s32_s27 = int_to_ptr.vmem [resolvable:$true] %s31_s27 }
  0x12   :  { %s311_s28 = scalar_lea.vmem %s32_s27, 2048  ;;  %p316_p6 = scmp.lt.s32.totalorder %s32_s27, %s32_s27 }
  0x13   :  { %p312_p5 = scmp.ne.s32.totalorder %s32_s27, %s311_s28  ;;  %p317_p7 = scmp.lt.s32.totalorder %s311_s28, %s311_s28 }
  0x15   :  { %p318_p8 = por %p317_p7, %p316_p6 }
  0x17   :  { %p319_p9 = pnand %p318_p8, %p312_p5 }
  0x19   :  { %322 = shalt.err (!%p319_p9)
}
  0x1a   :  { %37 = dma.hbm_to_vmem [thread:$0]  %s384_s1, 2048, %s32_s27, [#allocation6], %s328_s23, %s328_s23, %s329_s24  }
  0x1b   :  { %323 = dma.done.wait [#allocation4], 256  }
  0x1c   :  { %324 = vsyncadd [#allocation4], 4294967040 }
  0x1d   :  { %325 = dma.done.wait [#allocation6], 2048  }
  0x1e   :  { %326 = vsyncadd [#allocation6], 4294965248  ;;  %v67_v1 = vld [vmem:[#allocation5 + $0x78] sm:$0xff]  ;;  %v66_v2 = vld [vmem:[#allocation5 + $0x70] sm:$0xff]  ;;  %s331_s6 = smov 64   ;;  %vm183_vm0 = vcmask 523264  }
  0x1f   :  { %231 = vmatprep.subr.mxu0 %v67_v1  ;;  %v65_v3 = vld [vmem:[#allocation5 + $0x68] sm:$0xff]  ;;  %v64_v4 = vld [vmem:[#allocation5 + $0x60] sm:$0xff]  ;;  %v50_v5 = vld [vmem:[#allocation3] sm:$0xff]  ;;  %vm199_vm1 = vcmask 7168  }
  0x20   :  { %232 = vmatpush3.msra.mxu0 %v67_v1  ;;  %v63_v6 = vld [vmem:[#allocation5 + $0x58] sm:$0xff]  ;;  %263 = vmatprep.mubr.f32.mxu0 %v50_v5  ;;  %v62_v7 = vld [vmem:[#allocation5 + $0x50] sm:$0xff]  ;;  %v61_v8 = vld [vmem:[#allocation5 + $0x48] sm:$0xff] }
  0x21   :  { %233 = vmatprep.subr.mxu0 %v66_v2  ;;  %v60_v9 = vld [vmem:[#allocation5 + $0x40] sm:$0xff]  ;;  %v59_v10 = vld [vmem:[#allocation5 + $0x38] sm:$0xff]  ;;  %v58_v11 = vld [vmem:[#allocation5 + $0x30] sm:$0xff] }
  0x22   :  { %234 = vmatpush3.msra.mxu0 %v66_v2  ;;  %v57_v12 = vld [vmem:[#allocation5 + $0x28] sm:$0xff]  ;;  %v56_v13 = vld [vmem:[#allocation5 + $0x20] sm:$0xff]  ;;  %v55_v14 = vld [vmem:[#allocation5 + $0x18] sm:$0xff] }
  0x23   :  { %235 = vmatprep.subr.mxu0 %v65_v3  ;;  %v54_v15 = vld [vmem:[#allocation5 + $0x10] sm:$0xff]  ;;  %v53_v16 = vld [vmem:[#allocation5 + $0x8] sm:$0xff]  ;;  %v52_v17 = vld [vmem:[#allocation5] sm:$0xff] }
  0x24   :  { %236 = vmatpush3.msra.mxu0 %v65_v3  ;;  %v51_v18 = vld [vmem:[#allocation3 + $0x8] sm:$0xff]  ;;  %v208_v19 = vld [vmem:[%s385_s2] ss:$0 sm:$0xff] }
  0x25   :  { %237 = vmatprep.subr.mxu0 %v64_v4  ;;  %v211_v34 = vld [vmem:[%s386_s3] ss:$0 sm:$0xff] }
  0x26   :  { %238 = vmatpush3.msra.mxu0 %v64_v4  ;;  %v212_v43 = vld [vmem:[#allocation2] ss:$0 sm:$0xff] }
  0x27   :  { %239 = vmatprep.subr.mxu0 %v63_v6 }
  0x28   :  { %240 = vmatpush3.msra.mxu0 %v63_v6 }
  0x29   :  { %241 = vmatprep.subr.mxu0 %v62_v7 }
  0x2a   :  { %242 = vmatpush3.msra.mxu0 %v62_v7 }
  0x2b   :  { %243 = vmatprep.subr.mxu0 %v61_v8 }
  0x2c   :  { %244 = vmatpush3.msra.mxu0 %v61_v8 }
  0x2d   :  { %245 = vmatprep.subr.mxu0 %v60_v9 }
  0x2e   :  { %246 = vmatpush3.msra.mxu0 %v60_v9 }
  0x2f   :  { %247 = vmatprep.subr.mxu0 %v59_v10 }
  0x30   :  { %248 = vmatpush3.msra.mxu0 %v59_v10 }
  0x31   :  { %249 = vmatprep.subr.mxu0 %v58_v11 }
  0x32   :  { %250 = vmatpush3.msra.mxu0 %v58_v11 }
  0x33   :  { %251 = vmatprep.subr.mxu0 %v57_v12 }
  0x34   :  { %252 = vmatpush3.msra.mxu0 %v57_v12 }
  0x35   :  { %253 = vmatprep.subr.mxu0 %v56_v13 }
  0x36   :  { %254 = vmatpush3.msra.mxu0 %v56_v13 }
  0x37   :  { %255 = vmatprep.subr.mxu0 %v55_v14 }
  0x38   :  { %256 = vmatpush3.msra.mxu0 %v55_v14 }
  0x39   :  { %257 = vmatprep.subr.mxu0 %v54_v15 }
  0x3a   :  { %258 = vmatpush3.msra.mxu0 %v54_v15 }
  0x3b   :  { %259 = vmatprep.subr.mxu0 %v53_v16 }
  0x3c   :  { %260 = vmatpush3.msra.mxu0 %v53_v16 }
  0x3d   :  { %261 = vmatprep.subr.mxu0 %v52_v17 }
  0x3e   :  { %262 = vmatpush3.msra.mxu0 %v52_v17 }
  0x3f   :  { %264 = vmatmul.mubr.f32.vlgmr.msra.gmra.mxu0 %v51_v18 }
  0xff   :  { %v265_v20 = vpop.f32.mrf.mxu0 }
 0x100   :  { %v147_v21 = vadd.f32 %v265_v20, %v208_v19 }
 0x101   :  { %v141_v22 = vpop.f32.mrf.mxu0 }
 0x102   :  { %v210_v23 = vmul.f32 -1.442695, %v147_v21  ;;  %v142_v24 = vadd.f32 %v208_v19, %v141_v22 }
 0x104   :  { %v209_v25 = vmul.f32 -1.442695, %v142_v24  ;;  %271 = vpow2.f32 %v210_v23 }
 0x106   :  { %273 = vpow2.f32 %v209_v25 }
 0x111   :  { %v272_v26 = vpop.eup %271 }
 0x112   :  { %v159_v29 = vadd.f32 1.0, %v272_v26 }
 0x113   :  { %v274_v27 = vpop.eup %273 }
 0x114   :  { %v158_v28 = vadd.f32 1.0, %v274_v27 }
 0x116   :  { %275 = vrcp.f32 %v158_v28 }
 0x117   :  { %277 = vrcp.f32 %v159_v29 }
 0x118   :  { %279 = vtanh.f32 %v142_v24 }
 0x119   :  { %281 = vtanh.f32 %v147_v21 }
 0x123   :  { %v276_v30 = vpop.eup %275 }
 0x124   :  { %166 = vrot.lane.b32.xlu0 %v276_v30, %s331_s6  ;;  %v278_v31 = vpop.eup %277 }
 0x125   :  { %v280_v32 = vpop.eup %279 }
 0x126   :  { %v282_v37 = vpop.eup %281 }
 0x128   :  { %168 = vrot.lane.b32.xlu0 %v278_v31, %s331_s6 }
 0x196   :  { %v167_v33 = vpop.permute.xlu0 %166 }
 0x197   :  { %v172_v35 = vmul.f32 %v280_v32, %v167_v33 }
 0x199   :  { %v181_v36 = vmul.f32 %v211_v34, %v172_v35 }
 0x19a   :  { %v169_v38 = vpop.permute.xlu0 %168 }
 0x19b   :  { %v173_v39 = vmul.f32 %v282_v37, %v169_v38  ;;  %v184_v40 = vsel %vm183_vm0, %v181_v36, 0.0 }
 0x19c   :  { %185 = vadd.xlane.f32.xlu1 %v184_v40 }
 0x19d   :  { %v182_v41 = vmul.f32 %v211_v34, %v173_v39 }
 0x19f   :  { %v187_v42 = vsel %vm183_vm0, %v182_v41, 0.0 }
 0x1a0   :  { %188 = vadd.xlane.f32.xlu1 %v187_v42 }
 0x225   :  { %v186_v44 = vpop.xlane.xlu1 %185 }
 0x226   :  { %v197_v45 = vadd.f32 %v212_v43, %v186_v44 }
 0x228   :  { %200 = vst.msk [vmem:[%s388_s5] sm:$0xff] %vm199_vm1, %v197_v45 }
 0x229   :  { %v189_v46 = vpop.xlane.xlu1 %188 }
 0x22a   :  { %v198_v47 = vadd.f32 %v212_v43, %v189_v46 }
 0x22c   :  { %201 = vst.msk [vmem:[%s388_s5 + $0x8] sm:$0xff] %vm199_vm1, %v198_v47 }
 0x22d   :  { %206 = vsyncpa [#allocation4], 1 }
 0x22e   :  { %207 = vsyncpa [#allocation6], 1 }

</bundles_post_ra>
